<compile_context>
chip_gen: v7x
topology: tpu7x:2x2x1
jax: 0.10.0
libtpu: 0.0.40
codegen_flags: <defaults>
</compile_context>

<pallas_src>
import functools

import jax
import jax.numpy as jnp
from jax import lax
from jax.experimental import pallas as pl
from jax.experimental.pallas import tpu as pltpu

_NEG_BIG = -1e30  # finite causal fill: exp(_NEG_BIG - m) underflows to 0, never NaN


def _pick_tile(total, preferred, quantum):
    """Largest multiple of `quantum` <= preferred that divides `total`; else `total`."""
    t = min(preferred, total)
    t -= t % quantum
    while t >= quantum:
        if total % t == 0:
            return t
        t -= quantum
    return total


# --------------------------------------------------------------------------- #
# Stage 1: q/k/v projection, one projection per grid step                     #
# --------------------------------------------------------------------------- #
def _qkv_proj_kernel(x_ref, w_ref, b_ref, out_ref):
    # x_ref: (1, tm, D)   w_ref: (1, D, D)   b_ref: (1, 1, D)   out_ref: (1, 1, tm, D)
    acc = jnp.dot(x_ref[0], w_ref[0], preferred_element_type=jnp.float32)
    acc = acc + b_ref[0].astype(jnp.float32)
    out_ref[0, 0] = acc.astype(out_ref.dtype)


# --------------------------------------------------------------------------- #
# Stage 2: flash attention (all heads per step) + fused output projection     #
# --------------------------------------------------------------------------- #
def _flash_attn_kernel(
    q_ref,      # (1, 1, tq, D)
    k_ref,      # (1, 1, tk, D)
    v_ref,      # (1, 1, tk, D)
    mask_ref,   # (1, 1, tq, tk)  additive mask tile (shared by all heads)
    wo_ref,     # (D, D)          out_proj weight (in->out layout), resident
    bo_ref,     # (1, D)
    out_ref,    # (1, tq, D)
    m_s,        # VMEM (H, tq, 1)  f32 running max
    l_s,        # VMEM (H, tq, 1)  f32 running denom
    acc_s,      # VMEM (H, tq, hd) f32 per-head numerator
    *,
    num_heads: int,
):
    qi = pl.program_id(1)
    kv = pl.program_id(2)
    num_kv = pl.num_programs(2)

    block_q = q_ref.shape[2]
    block_k = k_ref.shape[2]
    d_model = q_ref.shape[3]
    head_dim = d_model // num_heads

    q_start = qi * block_q
    k_start = kv * block_k
    # Tile fully above the causal diagonal: nothing to do (its DMA was clamped away).
    not_skipped = k_start < q_start + block_q
    # Tile fully below the diagonal: no causal select needed, just add the mask.
    interior = (k_start + block_k - 1) <= q_start

    @pl.when(kv == 0)
    def _init():
        m_s[...] = jnp.full(m_s.shape, -jnp.inf, jnp.float32)
        l_s[...] = jnp.zeros(l_s.shape, jnp.float32)
        acc_s[...] = jnp.zeros(acc_s.shape, jnp.float32)

    def _online_softmax(bias):
        # bias: (tq, tk) f32, shared by all heads (computed once per step).
        q = q_ref[0, 0]                                   # (tq, D)
        k = k_ref[0, 0]                                   # (tk, D)
        v = v_ref[0, 0]                                   # (tk, D)
        for h in range(num_heads):                        # static unroll
            sl = slice(h * head_dim, (h + 1) * head_dim)
            # Contract the trailing head dims -> no materialized k.T.
            s = lax.dot_general(q[:, sl], k[:, sl], (((1,), (1,)), ((), ())),
                                preferred_element_type=jnp.float32)       # (tq, tk)
            s = s + bias
            m_prev = m_s[h]
            m_new = jnp.maximum(m_prev, jnp.max(s, axis=-1, keepdims=True))
            alpha = jnp.exp(m_prev - m_new)
            p = jnp.exp(s - m_new)
            l_s[h] = alpha * l_s[h] + jnp.sum(p, axis=-1, keepdims=True)
            acc_s[h] = alpha * acc_s[h] + jnp.dot(
                p.astype(v.dtype), v[:, sl], preferred_element_type=jnp.float32)
            m_s[h] = m_new

    @pl.when(jnp.logical_and(not_skipped, interior))
    def _interior_tile():
        _online_softmax(mask_ref[0, 0].astype(jnp.float32))

    @pl.when(jnp.logical_and(not_skipped, jnp.logical_not(interior)))
    def _straddling_tile():
        row = lax.broadcasted_iota(jnp.int32, (block_q, block_k), 0) + q_start
        col = lax.broadcasted_iota(jnp.int32, (block_q, block_k), 1) + k_start
        bias = jnp.where(row >= col, mask_ref[0, 0].astype(jnp.float32),
                         jnp.float32(_NEG_BIG))
        _online_softmax(bias)

    @pl.when(kv == num_kv - 1)
    def _finalize():
        acc = jnp.zeros((block_q, d_model), jnp.float32)
        for h in range(num_heads):
            o_h = acc_s[h] * (1.0 / l_s[h])               # (tq, hd) f32, exact divide
            w_h = wo_ref[h * head_dim:(h + 1) * head_dim, :]  # (hd, D)
            acc = acc + jnp.dot(o_h.astype(wo_ref.dtype), w_h,
                                preferred_element_type=jnp.float32)
        out_ref[0] = (acc + bo_ref[...].astype(jnp.float32)).astype(out_ref.dtype)


# --------------------------------------------------------------------------- #
# Wrapper                                                                     #
# --------------------------------------------------------------------------- #
def self_causal_attention(hidden_states, attention_mask, params, num_heads):
    """hidden_states: [B, T, D]; attention_mask (additive): [B, 1, T, T]."""
    B, T, D = hidden_states.shape
    head_dim = D // num_heads
    assert head_dim * num_heads == D
    scaling = float(head_dim) ** -0.5
    dtype = hidden_states.dtype

    # Fold scaling into the q projection; transpose torch (out,in) weights to
    # (in,out); stack q/k/v so stage 1 can tile one projection per grid step.
    w_stack = jnp.stack(
        [params["wq"].T * scaling, params["wk"].T, params["wv"].T]
    ).astype(dtype)                                              # (3, D, D)
    b_stack = jnp.stack(
        [params["bq"] * scaling, params["bk"], params["bv"]]
    ).reshape(3, 1, D).astype(jnp.float32)                       # (3, 1, D)
    w_o = params["wo"].T.astype(dtype)                           # (D, D) in->out
    b_o = params["bo"].reshape(1, D).astype(jnp.float32)         # (1, D)

    # ---------------- stage 1: q/k/v projection ---------------- #
    tm = _pick_tile(T, 256, 16)
    qkv = pl.pallas_call(
        _qkv_proj_kernel,
        out_shape=jax.ShapeDtypeStruct((3, B, T, D), dtype),
        grid_spec=pltpu.PrefetchScalarGridSpec(
            num_scalar_prefetch=0,
            grid=(3, B, T // tm),                        # projection axis outermost:
            in_specs=[                                   # each (D,D) weight stays
                pl.BlockSpec((1, tm, D), lambda p, b, i: (b, i, 0)),      # resident for
                pl.BlockSpec((1, D, D), lambda p, b, i: (p, 0, 0)),       # its whole sweep
                pl.BlockSpec((1, 1, D), lambda p, b, i: (p, 0, 0)),
            ],
            out_specs=pl.BlockSpec((1, 1, tm, D), lambda p, b, i: (p, b, i, 0)),
        ),
        compiler_params=pltpu.CompilerParams(
            dimension_semantics=("arbitrary", "arbitrary", "arbitrary")),
    )(hidden_states, w_stack, b_stack)

    # ------------- stage 2: flash attention + out projection ------------- #
    tq = _pick_tile(T, 256, 16)
    tk = _pick_tile(T, 512, 128)
    num_kv = T // tk

    def kv_clamp(qi, kv):
        # Last kv tile needed for query tile qi (causal); clamping means skipped
        # steps reference the already-resident block -> no DMA issued.
        last = (qi * tq + tq - 1) // tk
        return jnp.minimum(kv, last)

    out = pl.pallas_call(
        functools.partial(_flash_attn_kernel, num_heads=num_heads),
        out_shape=jax.ShapeDtypeStruct((B, T, D), dtype),
        grid_spec=pltpu.PrefetchScalarGridSpec(
            num_scalar_prefetch=0,
            grid=(B, T // tq, num_kv),
            in_specs=[
                pl.BlockSpec((1, 1, tq, D), lambda b, qi, kv: (0, b, qi, 0)),                # q
                pl.BlockSpec((1, 1, tk, D), lambda b, qi, kv: (1, b, kv_clamp(qi, kv), 0)),  # k
                pl.BlockSpec((1, 1, tk, D), lambda b, qi, kv: (2, b, kv_clamp(qi, kv), 0)),  # v
                pl.BlockSpec((1, 1, tq, tk),
                             lambda b, qi, kv: (b, 0, qi, kv_clamp(qi, kv))),                # mask
                pl.BlockSpec((D, D), lambda b, qi, kv: (0, 0)),                              # Wo
                pl.BlockSpec((1, D), lambda b, qi, kv: (0, 0)),                              # bo
            ],
            out_specs=pl.BlockSpec((1, tq, D), lambda b, qi, kv: (b, qi, 0)),
            scratch_shapes=[
                pltpu.VMEM((num_heads, tq, 1), jnp.float32),          # running max
                pltpu.VMEM((num_heads, tq, 1), jnp.float32),          # running denom
                pltpu.VMEM((num_heads, tq, head_dim), jnp.float32),   # per-head numerator
            ],
        ),
        compiler_params=pltpu.CompilerParams(
            dimension_semantics=("parallel", "parallel", "arbitrary")),
    )(qkv, qkv, qkv, attention_mask, w_o, b_o)

    return out, None  # matches (attn_output, None) for return_attn_map=False


# --------------------------------------------------------------------------- #
# Pure-JAX reference mirroring the PyTorch forward                            #
# --------------------------------------------------------------------------- #
def _reference(hidden_states, attention_mask, params, num_heads):
    B, T, D = hidden_states.shape
    hd = D // num_heads
    scaling = float(hd) ** -0.5

    def lin(x, w, b):
        return x @ w.T + b

    q = lin(hidden_states, params["wq"], params["bq"]) * scaling
    k = lin(hidden_states, params["wk"], params["bk"])
    v = lin(hidden_states, params["wv"], params["bv"])

    def split(x):
        return x.reshape(B, T, num_heads, hd).transpose(0, 2, 1, 3)  # (B,H,T,hd)

    q, k, v = split(q), split(k), split(v)
    causal = jnp.tril(jnp.ones((T, T), jnp.float32))[None, None]
    s = jnp.einsum("bhqd,bhkd->bhqk", q, k)
    s = jnp.where(causal == 0, -jnp.inf, s)
    s = s + attention_mask
    p = jax.nn.softmax(s, axis=-1)
    o = jnp.einsum("bhqk,bhkd->bhqd", p, v)
    o = o.transpose(0, 2, 1, 3).reshape(B, T, D)
    return lin(o, params["wo"], params["bo"])


if __name__ == "__main__":
    B, T, D, H = 2, 8, 32, 4

    key = jax.random.PRNGKey(0)
    keys = jax.random.split(key, 10)
    params = {
        "wq": jax.random.normal(keys[0], (D, D), jnp.float32) * 0.05,
        "bq": jax.random.normal(keys[1], (D,), jnp.float32) * 0.05,
        "wk": jax.random.normal(keys[2], (D, D), jnp.float32) * 0.05,
        "bk": jax.random.normal(keys[3], (D,), jnp.float32) * 0.05,
        "wv": jax.random.normal(keys[4], (D, D), jnp.float32) * 0.05,
        "bv": jax.random.normal(keys[5], (D,), jnp.float32) * 0.05,
        "wo": jax.random.normal(keys[6], (D, D), jnp.float32) * 0.05,
        "bo": jax.random.normal(keys[7], (D,), jnp.float32) * 0.05,
    }

    hidden_states = jax.random.normal(keys[8], (B, T, D), jnp.float32)
    # Additive attention mask [B, 1, T, T]: batch 1 masks its last two key
    # positions with a large finite negative (padding-style mask).
    key_mask = jnp.zeros((B, T), jnp.float32).at[1, T - 2:].set(-1e9)
    attention_mask = jnp.zeros((B, 1, T, T), jnp.float32) + key_mask[:, None, None, :]

    out, _ = self_causal_attention(hidden_states, attention_mask, params, H)
    out = jax.block_until_ready(out)

    ref = _reference(hidden_states, attention_mask, params, H)
    assert out.shape == (B, T, D)
    assert jnp.allclose(out, ref, atol=2e-3, rtol=2e-3), "mismatch vs reference"

    print("KERNEL_OK")
</pallas_src>

<mosaic_0001>
module attributes {stable_mosaic.version = 11 : i64} {
  func.func @_qkv_proj_kernel(%arg0: i32, %arg1: i32, %arg2: i32, %arg3: memref<1x8x32xf32, #tpu.memory_space<vmem>>, %arg4: memref<1x32x32xf32, #tpu.memory_space<vmem>>, %arg5: memref<1x1x32xf32, #tpu.memory_space<vmem>>, %arg6: memref<1x1x8x32xf32, #tpu.memory_space<vmem>>) attributes {dimension_semantics = [#tpu.dimension_semantics<arbitrary>, #tpu.dimension_semantics<arbitrary>, #tpu.dimension_semantics<arbitrary>], iteration_bounds = array<i64: 3, 2, 1>, scalar_prefetch = 0 : i64, scratch_operands = 0 : i64, tpu.core_type = #tpu.core_type<tc>, window_params = [{transform_indices = @transform_0, window_bounds = array<i64: 1, 8, 32>}, {transform_indices = @transform_1, window_bounds = array<i64: 1, 32, 32>}, {transform_indices = @transform_2, window_bounds = array<i64: 1, 1, 32>}, {transform_indices = @transform_3, window_bounds = array<i64: 1, 1, 8, 32>}]} {
    %c0 = arith.constant 0 : index
    %c0_0 = arith.constant 0 : index
    %c0_1 = arith.constant 0 : index
    %0 = vector.load %arg3[%c0, %c0_0, %c0_1] : memref<1x8x32xf32, #tpu.memory_space<vmem>>, vector<1x8x32xf32>
    %1 = vector.shape_cast %0 : vector<1x8x32xf32> to vector<8x32xf32>
    %c0_2 = arith.constant 0 : index
    %c0_3 = arith.constant 0 : index
    %c0_4 = arith.constant 0 : index
    %2 = vector.load %arg4[%c0_2, %c0_3, %c0_4] : memref<1x32x32xf32, #tpu.memory_space<vmem>>, vector<1x32x32xf32>
    %3 = vector.shape_cast %2 : vector<1x32x32xf32> to vector<32x32xf32>
    %cst = arith.constant dense<0.000000e+00> : vector<8x32xf32>
    %4 = tpu.matmul %1, %3, %cst {dimension_numbers = #tpu.dot_dimension_numbers<[1], [0], [0], [1], [0, 0, 1, 1], [], []>} : vector<8x32xf32>, vector<32x32xf32>, vector<8x32xf32> -> vector<8x32xf32>
    %c0_5 = arith.constant 0 : index
    %c0_6 = arith.constant 0 : index
    %c0_7 = arith.constant 0 : index
    %5 = vector.load %arg5[%c0_5, %c0_6, %c0_7] : memref<1x1x32xf32, #tpu.memory_space<vmem>>, vector<1x1x32xf32>
    %6 = vector.shape_cast %5 : vector<1x1x32xf32> to vector<1x32xf32>
    %7 = vector.broadcast %6 : vector<1x32xf32> to vector<8x32xf32>
    %8 = arith.addf %4, %7 : vector<8x32xf32>
    %c0_8 = arith.constant 0 : index
    %c0_9 = arith.constant 0 : index
    %c0_10 = arith.constant 0 : index
    %c0_11 = arith.constant 0 : index
    %9 = vector.load %arg6[%c0_8, %c0_9, %c0_10, %c0_11] : memref<1x1x8x32xf32, #tpu.memory_space<vmem>>, vector<1x1x8x32xf32>
    %10 = vector.shape_cast %9 : vector<1x1x8x32xf32> to vector<8x32xf32>
    %11 = vector.shape_cast %8 : vector<8x32xf32> to vector<1x1x8x32xf32>
    tpu.vector_store %arg6[%c0_8, %c0_9, %c0_10, %c0_11], %11 {strides = array<i32>} : memref<1x1x8x32xf32, #tpu.memory_space<vmem>>, vector<1x1x8x32xf32>,
    return
  }
  func.func @transform_0(%arg0: i32, %arg1: i32, %arg2: i32) -> (i32, i32, i32) {
    %c0_i32 = arith.constant 0 : i32
    %c0_i32_0 = arith.constant 0 : i32
    return %arg1, %arg2, %c0_i32 : i32, i32, i32
  }
  func.func @transform_1(%arg0: i32, %arg1: i32, %arg2: i32) -> (i32, i32, i32) {
    %c0_i32 = arith.constant 0 : i32
    %c0_i32_0 = arith.constant 0 : i32
    %c0_i32_1 = arith.constant 0 : i32
    return %arg0, %c0_i32, %c0_i32_0 : i32, i32, i32
  }
  func.func @transform_2(%arg0: i32, %arg1: i32, %arg2: i32) -> (i32, i32, i32) {
    %c0_i32 = arith.constant 0 : i32
    %c0_i32_0 = arith.constant 0 : i32
    %c0_i32_1 = arith.constant 0 : i32
    return %arg0, %c0_i32, %c0_i32_0 : i32, i32, i32
  }
  func.func @transform_3(%arg0: i32, %arg1: i32, %arg2: i32) -> (i32, i32, i32, i32) {
    %c0_i32 = arith.constant 0 : i32
    %c0_i32_0 = arith.constant 0 : i32
    return %arg0, %arg1, %arg2, %c0_i32 : i32, i32, i32, i32
  }
}

</mosaic_0001>

<bundles_post_ra>
// kernel: tpu_custom_call.1
= control target key start
LH: loop header
LB: loop body
LE: loop exit
PB: predicated region body
PF: predicated region fallthrough
CT: control target
= control target key end

     0   :  { %s1244_s0 = inlined_call_operand.hbm [shape: f32[2,8,32], index: 0, kind: input, shape index: {}]   ;;  %s1245_s1 = inlined_call_operand.hbm [shape: f32[3,32,32], index: 1, kind: input, shape index: {}]   ;;  %s1246_s2 = inlined_call_operand.vmem [shape: f32[3,1,32], index: 2, kind: input, shape index: {}]   ;;  %s1247_s3 = inlined_call_operand.hbm [shape: f32[3,2,8,32], index: 3, kind: output, shape index: {}]  }
   0x1   :  { %1255 = sst [smem:[#allocation18_spill]] %s1244_s0 }
   0x2   :  { %8 = vsyncpa [#allocation3], 0 }
   0x3   :  { %10 = vsyncpa [#allocation3 + $0x1], 0 }
   0x4   :  { %11 = vsyncpa [#allocation6], 0 }
   0x5   :  { %13 = vsyncpa [#allocation6 + $0x1], 0 }
   0x6   :  { %14 = vsyncpa [#allocation4], 0 }
   0x7   :  { %16 = vsyncpa [#allocation4 + $0x1], 0  ;;  %s909_s12 = smov 0   ;;  %s911_s13 = smov 0  }
   0x8   :  { %s913_s14 = smov 0   ;;  %s915_s15 = smov 0  }
   0x9   :  { %s917_s16 = smov 0   ;;  %s919_s17 = smov 0  }
   0xa   :  { %s921_s18 = smov 0   ;;  %s923_s19 = smov 0  }
   0xb   :  { %s925_s20 = smov 0   ;;  %s927_s21 = smov 0  }
   0xc   :  { %s929_s22 = smov 0   ;;  %s931_s23 = smov 0  }
   0xd   :  { %s933_s24 = smov 0   ;;  %s935_s25 = smov 0  }
   0xe LB: > { %1256 = sst [smem:[#allocation11_spill]] %s871_s23  ;;  %s490_s26 = sadd.s32 4294967295, %s879_s25   ;;  %s879_s25 = sphi %s935_s25, %s22_s25   ;;  %s875_s24 = sphi %s933_s24, %s1287_s24   ;;  %s871_s23 = sphi %s931_s23, %s1286_s23   ;;  %s867_s22 = sphi %s929_s22, %s1285_s22   ;;  %s863_s21 = sphi %s927_s21, %s1284_s21   ;;  %s859_s20 = sphi %s925_s20, %s1296_s20   ;;  %s855_s19 = sphi %s923_s19, %s1295_s19   ;;  %s851_s18 = sphi %s921_s18, %s1294_s18   ;;  %s847_s17 = sphi %s919_s17, %s1293_s17   ;;  %s843_s16 = sphi %s917_s16, %s1292_s16   ;;  %s839_s15 = sphi %s915_s15, %s1291_s15   ;;  %s835_s14 = sphi %s913_s14, %s1290_s14   ;;  %s831_s13 = sphi %s911_s13, %s1289_s13   ;;  %s827_s12 = sphi %s909_s12, %s1288_s12  }
   0xf   : > { %1257 = sst [smem:[#allocation12_spill]] %s875_s24  ;;  %s37_s28 = sadd.s32 1, %s871_s23 }
  0x10   : > { %s41_s29 = sadd.s32 1, %s875_s24  ;;  %p39_p0 = scmp.ge.s32.totalorder %s37_s28, 2 }
  0x11   : > { %s50_s30 = sadd.s32 1, %s859_s20  ;;  %p57_p1 = scmp.ne.s32.totalorder %s859_s20, %s855_s19 }
  0x12   : > { %p58_p2 = scmp.eq.s32.totalorder %s879_s25, 0  ;;  %s1298_s28 = smov (%p39_p0, %s37_s28), 0 }
  0x13   : > { %1258 = sst [smem:[#allocation13_spill]] %s1298_s28  ;;  %s1300_s29 = smov (!%p39_p0, %s41_s29), %s875_s24 }
  0x14   : > { %s45_s4 = ssub.s32 %s871_s23, %s1298_s28  ;;  %p992_p3 = por %p58_p2, %p57_p1 }
  0x15   : > { %p43_p4 = scmp.ge.s32.totalorder %s1300_s29, 3  ;;  %p48_p5 = scmp.eq.s32.totalorder %s45_s4, 0 }
  0x16   : > { %p63_p6 = scmp.ne.s32.totalorder %s855_s19, %s851_s18  ;;  %p64_p7 = scmp.eq.s32.totalorder %s490_s26, 0 }
  0x17   : > { %s1302_s29 = smov (%p43_p4, %s1300_s29), 0  ;;  %s76_s9 = sadd.s32 1, %s847_s17 }
  0x18   : > { %1260 = sst [smem:[#allocation14_spill]] %s1302_s29  ;;  %p1004_p8 = por %p64_p7, %p63_p6 }
  0x19   : > { %s1002_s6 = scalar_select %p48_p5, %s859_s20, %s50_s30  }
  0x1a   : > { %s1262_s7 = scalar_select %p1004_p8, 1, 0 }
  0x1b   : > { %1261 = sst [smem:[#allocation15_spill]] %s1002_s6  ;;  %s73_s8 = ssub.s32 %s875_s24, %s1302_s29 }
  0x1c   : > { %p74_p9 = scmp.eq.s32.totalorder %s73_s8, 0  ;;  %p83_p10 = scmp.ne.s32.totalorder %s847_s17, %s843_s16 }
  0x1d   : > { %p89_p11 = scmp.ne.s32.totalorder %s843_s16, %s839_s15  ;;  %s127_s30 = sor.u32 %s73_s8, %s45_s4 }
  0x1e   : > { %s1016_s10 = scalar_select %p74_p9, %s847_s17, %s76_s9  }
  0x1f   : > { %p1020_p12 = por %p83_p10, %p58_p2  ;;  %p1024_p13 = por %p89_p11, %p64_p7 }
  0x20   : > { %1263 = sst [smem:[#allocation16_spill]] %s1016_s10  ;;  %s132_s27 = sadd.s32 1, %s835_s14 }
  0x21   : > { %s1265_s18 = scalar_select %p1024_p13, 1, 0 }
  0x22   : > { %p130_p0 = scmp.eq.s32.totalorder %s127_s30, 0  ;;  %p142_p1 = scmp.ne.s32.totalorder %s835_s14, %s831_s13 }
  0x23   : > { %p143_p4 = scmp.eq.s32.totalorder %s490_s26, 5  ;;  %p148_p5 = scmp.ne.s32.totalorder %s831_s13, %s827_s12 }
  0x24   : > { %s1036_s15 = scalar_select %p130_p0, %s835_s14, %s132_s27  }
  0x25   : > { %p1038_p2 = por %p143_p4, %p142_p1  ;;  %s1268_s29 = sadd.s32 4294967294, %s879_s25  }
  0x26   : > { %1266 = sst [smem:[#allocation17_spill]] %s1036_s15  ;;  %p149_p6 = scmp.eq.s32.totalorder %s1268_s29, 5 }
  0x27   : > { %s1267_s9 = scalar_select %p1038_p2, 1, 0 }
  0x28   : > { %p550_p7 = scmp.lt.s32.totalorder %s879_s25, 6  ;;  %p1045_p9 = por %p149_p6, %p148_p5 }
  0x29   : > { %s169_s8 = sand.u32 1, %s859_s20   ;;  %s495_s28 = sshll.u32 %s871_s23, 7 }
  0x2a   : > { %s1269_s4 = scalar_select %p1045_p9, 1, 0 }
  0x2b   : > { %s494_s30 = sshll.u32 %s169_s8, 3  ;;  %s1270_s0 = sld [smem:[#allocation18_spill]] }
  0x2c   : > { %s173_s27 = scalar_lea.vmem [#allocation2], %s494_s30  ;;  %p1060_p10 = pnand %p550_p7, %p992_p3 }
  0x2d   : > { %s181_s15 = sshll.u32 %s173_s27, 4  ;;  %p1066_p11 = pnand %p550_p7, %p1020_p12  ;;  %s1056_s15 = int_to_ptr.vmem [resolvable:$true] %s181_s15 }
  0x2e   : > { %p671_p5 = pneg %p1060_p10 }
  0x31   : > { %s1054_s10 = scalar_lea.hbm %s1270_s0, %s495_s28  ;;  %s170_s28 = scalar_lea.sflag [#allocation3], %s169_s8 }
  0x32   : > { %s669_s30 = scalar_lea.hbm %s1054_s10, 128  ;;  %s674_s11 = scalar_lea.hbm %s1270_s0, 256 }
  0x33   : > { %p670_p4 = scmp.ne.s32.totalorder %s1054_s10, %s669_s30  ;;  %p675_p12 = scmp.lt.u32.totalorder %s1054_s10, %s1270_s0 }
  0x34   : > { %p676_p7 = scmp.lt.u32.totalorder %s674_s11, %s669_s30  ;;  %p678_p1 = scmp.lt.u32.totalorder %s669_s30, %s1054_s10 }
  0x35   : > { %p672_p3 = pnand %p671_p5, %p670_p4 }
  0x36   : > { %p677_p0 = por %p676_p7, %p675_p12 }
  0x37   : > { %p673_p6 = pneg %p672_p3 }
  0x38   : > { %p679_p9 = por %p678_p1, %p677_p0 }
  0x3a   : > { %p680_p2 = pnand %p679_p9, %p673_p6 }
  0x3c   : > { %683 = shalt.err (!%p680_p2)
}
  0x3d   : > { %s684_s8 = scalar_lea.vmem %s1056_s15, 128  ;;  %s881_s5 = smov [#allocation2]  }
  0x3e   : > { %p685_p4 = scmp.ne.s32.totalorder %s1056_s15, %s684_s8  ;;  %s689_s26 = sshll.u32 %s881_s5, 4  ;;  %s690_s26 = int_to_ptr.vmem [resolvable:$false] %s689_s26 }
  0x3f   : > { %s691_s23 = scalar_lea.vmem %s690_s26, 256  ;;  %p692_p8 = scmp.lt.s32.totalorder %s1056_s15, %s690_s26 }
  0x40   : > { %p687_p3 = pnand %p685_p4, %p671_p5  ;;  %p693_p12 = scmp.lt.s32.totalorder %s691_s23, %s684_s8 }
  0x42   : > { %p688_p13 = pneg %p687_p3  ;;  %p694_p7 = por %p693_p12, %p692_p8 }
  0x44   : > { %p695_p0 = pnand %p694_p7, %p688_p13 }
  0x46   : > { %698 = shalt.err (!%p695_p0)
}
  0x47   : > { %542 = dma.hbm_to_vmem [thread:$0]  (!%p1060_p10), %s1054_s10, 128, %s1056_s15, %s170_s28  }
  0x48   : > { %p1273_p2 = scmp.lt.s32.totalorder %s879_s25, 7  ;;  %p1274_p9 = scmp.ge.s32.totalorder %s879_s25, 1 }
  0x49   : > { %s188_s11 = sand.u32 1, %s847_s17   ;;  %s510_s27 = sshll.u32 %s875_s24, 9 }
  0x4a   : > { %p1101_p1 = pnand %p1274_p9, %p1273_p2  ;;  %s496_s8 = sshll.u32 %s188_s11, 5 }
  0x4b   : > { %s1110_s26 = scalar_lea.hbm %s1245_s1, %s510_s27  ;;  %s192_s23 = scalar_lea.vmem [#allocation5], %s496_s8 }
  0x4c   : > { %s199_s10 = sshll.u32 %s192_s23, 4  ;;  %s1114_s15 = scalar_lea.sflag [#allocation6], %s188_s11  ;;  %s1112_s10 = int_to_ptr.vmem [resolvable:$true] %s199_s10 }
  0x4d   : > { %s699_s28 = scalar_lea.hbm %s1110_s26, 512  ;;  %p701_p13 = pneg %p1066_p11 }
  0x4e   : > { %p700_p8 = scmp.ne.s32.totalorder %s1110_s26, %s699_s28  ;;  %s704_s29 = scalar_lea.hbm %s1245_s1, 1536 }
  0x4f   : > { %p705_p6 = scmp.lt.u32.totalorder %s1110_s26, %s1245_s1  ;;  %p706_p4 = scmp.lt.u32.totalorder %s704_s29, %s699_s28 }
  0x50   : > { %p702_p10 = pnand %p701_p13, %p700_p8  ;;  %p708_p12 = scmp.lt.u32.totalorder %s699_s28, %s1110_s26 }
  0x51   : > { %p707_p3 = por %p706_p4, %p705_p6 }
  0x52   : > { %p703_p5 = pneg %p702_p10 }
  0x53   : > { %p709_p7 = por %p708_p12, %p707_p3 }
  0x55   : > { %p710_p0 = pnand %p709_p7, %p703_p5 }
  0x57   : > { %713 = shalt.err (!%p710_p0)
}
  0x58   : > { %s714_s11 = scalar_lea.vmem %s1112_s10, 512  ;;  %s882_s8 = smov [#allocation5]  }
  0x59   : > { %p715_p2 = scmp.ne.s32.totalorder %s1112_s10, %s714_s11  ;;  %s719_s23 = sshll.u32 %s882_s8, 4  ;;  %s720_s23 = int_to_ptr.vmem [resolvable:$false] %s719_s23 }
  0x5a   : > { %s721_s0 = scalar_lea.vmem %s720_s23, 1024  ;;  %p722_p10 = scmp.lt.s32.totalorder %s1112_s10, %s720_s23 }
  0x5b   : > { %p717_p9 = pnand %p715_p2, %p701_p13  ;;  %p723_p6 = scmp.lt.s32.totalorder %s721_s0, %s714_s11 }
  0x5d   : > { %p718_p8 = pneg %p717_p9  ;;  %p724_p4 = por %p723_p6, %p722_p10 }
  0x5f   : > { %p725_p3 = pnand %p724_p4, %p718_p8 }
  0x61   : > { %728 = shalt.err (!%p725_p3)
}
  0x62   : > { %s883_s24 = smov 128   ;;  %s884_s28 = smov 8  }
  0x63   : > { %545 = dma.hbm_to_vmem [thread:$0]  (!%p1066_p11), %s1110_s26, 512, %s1112_s10, %s1114_s15, %s883_s24, %s883_s24, %s884_s28  }
  0x64   : > { %217 = sbr.rel (%p1101_p1) target bundleno = 350 (0x15e), region = 32  ;;  %s219_s27 = sand.u32 (!%p1101_p1), 1, %s855_s19  }
  0x65   : > { %s500_s5 = sshll.u32 (!%p1101_p1), %s219_s27, 3  ;;  %s220_s29 = scalar_lea.sflag (!%p1101_p1), [#allocation3], %s219_s27 }
  0x66   : > { %s223_s11 = scalar_lea.vmem (!%p1101_p1), [#allocation2], %s500_s5  ;;  %p1276_p13 = scmp.ne.s32.totalorder (!%p1101_p1), %s1262_s7, 0 }
  0x6b   : > { %814 = dma.done.wait (%p1276_p13), %s220_s29, 128  }
  0x6c   : > { %816 = vsyncadd (%p1276_p13), %s220_s29, 4294967168  ;;  %s228_s8 = sand.u32 1, %s843_s16   ;;  %p1277_p11 = scmp.ne.s32.totalorder %s1265_s18, 0 }
  0x6d   : > { %s501_s23 = sshll.u32 %s228_s8, 5  ;;  %s229_s6 = scalar_lea.sflag [#allocation6], %s228_s8 }
  0x6e   : > { %s232_s26 = scalar_lea.vmem [#allocation5], %s501_s23 }
  0x6f   : > { %818 = dma.done.wait (%p1277_p11), %s229_s6, 512  }
  0x70   : > { %820 = vsyncadd (%p1277_p11), %s229_s6, 4294966784  ;;  %v885_v0 = vmov 0.0|0.0   ;;  %vm886_vm0 = vmmov 0   ;;  %v887_v1 = vmov 0.0   ;;  %v267_v2 = vld [vmem:[%s232_s26] sm:$0xff]  ;;  %v268_v3 = vld [vmem:[%s232_s26 + $0x8] sm:$0xff] }
  0x71   : > { %527 = vmatprep.subr.bf16.mxu0 %v885_v0  ;;  %524 = vmatprep.mubr.msk.f32.mxu0 %vm886_vm0, %v887_v1  ;;  %v269_v4 = vld [vmem:[%s232_s26 + $0x10] sm:$0xff]  ;;  %v528_v5 = vpack.c.bf16 %v268_v3, %v267_v2  ;;  %v270_v6 = vld [vmem:[%s232_s26 + $0x18] sm:$0xff]  ;;  %vm278_vm1 = vcmask 261120   ;;  %p263_p1 = scmp.lt.s32.totalorder %s867_s22, 2  ;;  %s260_s7 = sand.u32 1, %s831_s13  }
  0x72   : > { %v531_v7 = vpack.c.bf16 %v270_v6, %v269_v4  ;;  %v266_v8 = vld [vmem:[%s223_s11] sm:$0xff]  ;;  %s502_s30 = sshll.u32 %s260_s7, 3  ;;  %s506_s10 = sshll.u32 %s867_s22, 1 }
  0x73   : > { %529 = vmatpush3.bf16.msra.mxu0 %v528_v5  ;;  %s264_s18 = scalar_select %p263_p1, %s867_s22, 2 }
  0x74   : > { %530 = vmatprep.subr.bf16.mxu0 %v885_v0  ;;  %s366_s28 = sadd.s32 %s863_s21, %s506_s10  ;;  %s262_s5 = scalar_lea.vmem [#allocation7], %s502_s30 }
  0x75   : > { %s265_s24 = scalar_lea.vmem %s1246_s2, %s264_s18  ;;  %s507_s27 = sshll.u32 %s366_s28, 7 }
  0x76   : > { %v503_v9 = vld [vmem:[%s265_s24] ss:$0 sm:$0xff]  ;;  %s370_s29 = sshll.u32 %s262_s5, 4  ;;  %s1166_s23 = scalar_lea.hbm %s1247_s3, %s507_s27  ;;  %s1168_s29 = int_to_ptr.vmem [resolvable:$true] %s370_s29 }
  0x77   : > { %532 = vmatpush3.bf16.msra.mxu0 %v531_v7  ;;  %s354_s21 = scalar_lea.sflag [#allocation4], %s260_s7  ;;  %s729_s22 = scalar_lea.vmem %s1168_s29, 128 }
  0x78   : > { %p730_p5 = scmp.ne.s32.totalorder %s1168_s29, %s729_s22  ;;  %p1278_p12 = scmp.ne.s32.totalorder %s1267_s9, 0 }
  0x79   : > { %s888_s6 = smov [#allocation7]  }
  0x7a   : > { %525 = vmatmul.mubr.msk.f32.vlgmr.msra.gmra.mrb[0].mxu0 %vm278_vm1, %v266_v8  ;;  %p731_p7 = pnand %p730_p5, %p1278_p12  ;;  %s733_s26 = sshll.u32 %s888_s6, 4  ;;  %s734_s26 = int_to_ptr.vmem [resolvable:$false] %s733_s26 }
  0x7b   : > { %s735_s18 = scalar_lea.vmem %s734_s26, 256  ;;  %p736_p2 = scmp.lt.s32.totalorder %s1168_s29, %s734_s26 }
  0x7c   : > { %p732_p0 = pneg %p731_p7  ;;  %p737_p9 = scmp.lt.s32.totalorder %s735_s18, %s729_s22 }
  0x7e   : > { %p738_p8 = por %p737_p9, %p736_p2 }
  0x80   : > { %p739_p10 = pnand %p738_p8, %p732_p0 }
 0x14d   : > { %v348_v10 = vpop.f32.mrb[0].mxu0 }
 0x14e   : > { %v349_v11 = vadd.f32 %v503_v9, %v348_v10  ;;  %v526_v12 = vpop.f32.mrb[1].mxu0 }
 0x150   : > { %352 = vst.msk [vmem:[%s262_s5] sm:$0xff] %vm278_vm1, %v349_v11 }
 0x151   : > { %742 = shalt.err (!%p739_p10)
}
 0x152   : > { %s743_s7 = scalar_lea.hbm %s1166_s23, 128  ;;  %s747_s15 = scalar_lea.hbm %s1247_s3, 768 }
 0x153   : > { %p744_p6 = scmp.ne.s32.totalorder %s1166_s23, %s743_s7  ;;  %p748_p13 = scmp.lt.u32.totalorder %s1166_s23, %s1247_s3 }
 0x154   : > { %p749_p11 = scmp.lt.u32.totalorder %s747_s15, %s743_s7  ;;  %p751_p5 = scmp.lt.u32.totalorder %s743_s7, %s1166_s23 }
 0x155   : > { %p745_p4 = pnand %p744_p6, %p1278_p12 }
 0x156   : > { %p750_p1 = por %p749_p11, %p748_p13 }
 0x157   : > { %p746_p3 = pneg %p745_p4 }
 0x158   : > { %p752_p7 = por %p751_p5, %p750_p1 }
 0x15a   : > { %p753_p0 = pnand %p752_p7, %p746_p3 }
 0x15c   : > { %756 = shalt.err (!%p753_p0)
}
 0x15d   : > { %537 = dma.vmem_to_hbm [thread:$0]  (%p1278_p12), %s1168_s29, 128, %s1166_s23, %s354_s21  }
 0x15e PF: > { %p551_p2 = scmp.ge.s32.totalorder %s879_s25, 2  ;;  %s382_s28 = sand.u32 1, %s827_s12  }
 0x15f   : > { %p1279_p9 = scmp.ne.s32.totalorder %s1269_s4, 0  ;;  %s383_s27 = scalar_lea.sflag [#allocation4], %s382_s28 }
 0x161   : > { %p547_p8 = pnand %p551_p2, %p1279_p9 }
 0x163   : > { %822 = dma.done.wait (!%p547_p8), %s383_s27, 128  }
 0x164   : > { %824 = vsyncadd (!%p547_p8), %s383_s27, 4294967168  ;;  %s22_s25 = sadd.s32 1, %s879_s25   ;;  %s1281_s9 = sld [smem:[#allocation17_spill]] }
 0x165   : > { %p1197_p10 = scmp.ge.s32.totalorder %s22_s25, 8   ;;  %s1282_s29 = sld [smem:[#allocation16_spill]] }
 0x166   : > { %s1283_s11 = sld [smem:[#allocation15_spill]]  ;;  %s1284_s21 = sld [smem:[#allocation11_spill]] }
 0x167   : > { %s1285_s22 = sld [smem:[#allocation12_spill]]  ;;  %s1286_s23 = sld [smem:[#allocation13_spill]] }
 0x168   : > { %s1287_s24 = sld [smem:[#allocation14_spill]]  ;;  %s1288_s12 = smov %s831_s13 }
 0x169   : > { %s1289_s13 = smov %s835_s14  ;;  %s1291_s15 = smov %s843_s16 }
 0x16a   : > { %s1290_s14 = smov %s1281_s9  ;;  %s1292_s16 = smov %s847_s17 }
 0x16b   : > { %s1293_s17 = smov %s1282_s29  ;;  %s1294_s18 = smov %s855_s19 }
 0x16c   : > { %s1295_s19 = smov %s859_s20  ;;  %s1296_s20 = smov %s1283_s11 }
 0x16d   :  { %21 = sbr.rel (!%p1197_p10) target bundleno = 14 (0xe), region = 93 }
 0x174   :  { %388 = vsyncpa [#allocation3], 1 }
 0x175   :  { %390 = vsyncpa [#allocation3 + $0x1], 1 }
 0x176   :  { %391 = vsyncpa [#allocation6], 1 }
 0x177   :  { %393 = vsyncpa [#allocation6 + $0x1], 1 }
 0x178   :  { %394 = vsyncpa [#allocation4], 1 }
 0x179   :  { %396 = vsyncpa [#allocation4 + $0x1], 1 }

</bundles_post_ra>
